<compile_context>
chip_gen: v7x
topology: tpu7x:2x2x1
jax: 0.10.0
libtpu: 0.0.40
codegen_flags: <defaults>
</compile_context>

<pallas_src>
import functools

import jax
import jax.numpy as jnp
from jax import lax
from jax.experimental import pallas as pl
from jax.experimental.pallas import tpu as pltpu


def _last_octave_cbr_kernel(p_ref, w_ref, offset_ref, o_ref):
    """One lane-tile of the fused LastOctaveConv + BN + ReLU.

    p_ref:      (K, Tcols)    bf16  im2col patches (high path ++ upsampled low path),
                                    batch folded into the column/lane axis
    w_ref:      (Cout, K)     bf16  BN-scale-folded weights, flattened (ci, kh, kw)
    offset_ref: (Cout, 1)     f32   folded BN shift (incl. conv bias & running mean)
    o_ref:      (Cout, Tcols) f32   lane-dense output tile
    """
    acc = jnp.dot(w_ref[...], p_ref[...], preferred_element_type=jnp.float32)
    o_ref[...] = jnp.maximum(acc + offset_ref[...], 0.0).astype(o_ref.dtype)


def _im2col(x_nchw, KH, KW, pad):
    """Stride-1 im2col: (N, C, H, W) -> (N, C*KH*KW, Ho*Wo).

    Row ordering is ci*KH*KW + kh*KW + kw, matching weights.reshape(Cout, -1).
    Wrapper-side layout plumbing (tiny tensors) so the kernel stays relayout-free.
    """
    N, C, H, W = x_nchw.shape
    Ho, Wo = H + 2 * pad - KH + 1, W + 2 * pad - KW + 1
    xp = jnp.pad(x_nchw, ((0, 0), (0, 0), (pad, pad), (pad, pad)))
    taps = [xp[:, :, kh:kh + Ho, kw:kw + Wo].reshape(N, C, 1, Ho * Wo)
            for kh in range(KH) for kw in range(KW)]
    return jnp.concatenate(taps, axis=2).reshape(N, C * KH * KW, Ho * Wo)


def _avg_pool_2x2(x_nchw):
    N, C, H, W = x_nchw.shape
    return x_nchw.reshape(N, C, H // 2, 2, W // 2, 2).mean(axis=(3, 5))


def _pick_col_tile(cols, target=2048):
    """Pick a lane-tile (multiple of 128) dividing `cols` (cols % 128 == 0).

    Prefers the largest divisor <= `target` so big problems get 512-2048-wide tiles
    (amortizes per-step overhead) while small problems still split into >=2 tiles
    when possible (keeps both v7x TensorCores busy via the 'parallel' grid axis).
    """
    if cols <= 256:
        return cols
    candidates = [c for c in range(128, cols, 128) if cols % c == 0]
    if not candidates:
        return cols
    le = [c for c in candidates if c <= target]
    return max(le) if le else min(candidates)


def last_octave_cbr(x_h, x_l, weights, bias, gamma, beta, running_mean,
                    running_var, *, alpha_in=0.5, alpha_out=0.0, stride=1,
                    padding=1, eps=1e-5, compute_dtype=jnp.bfloat16,
                    out_dtype=jnp.float32):
    """Forward pass of LastOCtaveCBR. x_h/x_l: NCHW, weights: OIHW, bias: (O,)."""
    out_channels, in_channels, KH, KW = weights.shape
    end_h_x = int(in_channels * (1 - alpha_in))
    end_h_y = int(out_channels * (1 - alpha_out))
    assert end_h_y == out_channels, "LastOctaveConv expects alpha_out == 0"

    if stride == 2:
        x_h = _avg_pool_2x2(x_h)
        x_l = _avg_pool_2x2(x_l)

    N, cin_h, H, W = x_h.shape
    _, cin_l, Hl, Wl = x_l.shape
    assert cin_h == end_h_x and cin_h + cin_l == in_channels

    Ho, Wo = H + 2 * padding - KH + 1, W + 2 * padding - KW + 1
    Hol, Wol = Hl + 2 * padding - KH + 1, Wl + 2 * padding - KW + 1
    assert Ho == 2 * Hol and Wo == 2 * Wol, "high path must be 2x the low path"

    Cout = end_h_y
    Kh, Kl = cin_h * KH * KW, cin_l * KH * KW
    K = Kh + Kl
    HWo, HWl = Ho * Wo, Hol * Wol

    # ---- fold BN (+ conv bias) ---------------------------------------------------
    # X_h2h + X_l2h = raw_h + upsample(raw_l) + 2*bias (bias added in both paths).
    # BN(y) = scale*(y - mean) + beta  ->  (scale folded into weights in f32) + offset
    scale = (gamma / jnp.sqrt(running_var + eps)).astype(jnp.float32)        # (Cout,)
    offset = (scale * (2.0 * bias - running_mean) + beta).astype(jnp.float32)
    offset = offset.reshape(Cout, 1)
    w_scaled = weights.astype(jnp.float32) * scale[:, None, None, None]
    w_h = w_scaled[:, :end_h_x].reshape(Cout, Kh)
    w_l = w_scaled[:, end_h_x:].reshape(Cout, Kl)
    w_cat = jnp.concatenate([w_h, w_l], axis=1).astype(compute_dtype)        # (Cout, K)

    # ---- wrapper-side layout plumbing (tiny tensors) -------------------------------
    patches_h = _im2col(x_h, KH, KW, padding)                                # (N, Kh, HWo)
    patches_l = _im2col(x_l, KH, KW, padding)                                # (N, Kl, HWl)
    # Nearest-2x upsample folded into a patch gather: high-res output (h, w) uses the
    # low-res receptive field at (h//2, w//2).  No upsample matmul needed.
    src = ((jnp.arange(Ho) // 2)[:, None] * Wol
           + (jnp.arange(Wo) // 2)[None, :]).reshape(HWo)
    patches_l_up = jnp.take(patches_l, src, axis=2)                          # (N, Kl, HWo)
    patches = jnp.concatenate([patches_h, patches_l_up], axis=1)             # (N, K, HWo)
    # Fold batch into the lane axis: (K, N*HWo), columns ordered (n, hwo).
    patches = patches.transpose(1, 0, 2).reshape(K, N * HWo).astype(compute_dtype)

    total_cols = N * HWo
    pad_cols = (-total_cols) % 128
    if pad_cols:
        patches = jnp.pad(patches, ((0, 0), (0, pad_cols)))
    cols = total_cols + pad_cols
    tcols = _pick_col_tile(cols)
    grid = (cols // tcols,)

    out_flat = pl.pallas_call(
        _last_octave_cbr_kernel,
        out_shape=jax.ShapeDtypeStruct((Cout, cols), out_dtype),
        grid=grid,
        in_specs=[
            pl.BlockSpec((K, tcols), lambda j: (0, j)),
            pl.BlockSpec((Cout, K), lambda j: (0, 0)),
            pl.BlockSpec((Cout, 1), lambda j: (0, 0)),
        ],
        out_specs=pl.BlockSpec((Cout, tcols), lambda j: (0, j)),
        compiler_params=pltpu.CompilerParams(
            dimension_semantics=("parallel",)),
    )(patches, w_cat, offset)

    out = out_flat[:, :total_cols].reshape(Cout, N, Ho, Wo).transpose(1, 0, 2, 3)
    return out


def _reference(x_h, x_l, weights, bias, gamma, beta, mean, var, *,
               alpha_in=0.5, padding=1, eps=1e-5, compute_dtype=jnp.float32,
               fold_scale_into_weights=False):
    """Pure-JAX (XLA) reference.

    With fold_scale_into_weights=True and compute_dtype=bf16 it applies the exact
    same numerics as the Pallas kernel (scale folded in f32, then bf16 cast, f32
    accumulation), for a tight correctness check.
    """
    in_channels = weights.shape[1]
    end_h_x = int(in_channels * (1 - alpha_in))
    scale = gamma / jnp.sqrt(var + eps)

    w = weights.astype(jnp.float32)
    if fold_scale_into_weights:
        w = w * scale[:, None, None, None]
    w_h = w[:, :end_h_x].astype(compute_dtype)
    w_l = w[:, end_h_x:].astype(compute_dtype)

    def conv(x, wgt):
        return lax.conv_general_dilated(
            x.astype(compute_dtype), wgt, window_strides=(1, 1),
            padding=[(padding, padding), (padding, padding)],
            dimension_numbers=("NCHW", "OIHW", "NCHW"),
            preferred_element_type=jnp.float32)

    y_h = conv(x_h, w_h) + (0.0 if fold_scale_into_weights
                            else bias.reshape(1, -1, 1, 1))
    y_l = conv(x_l, w_l) + (0.0 if fold_scale_into_weights
                            else bias.reshape(1, -1, 1, 1))
    y_l = jnp.repeat(jnp.repeat(y_l, 2, axis=2), 2, axis=3)   # nearest 2x
    s = y_h + y_l

    if fold_scale_into_weights:
        offset = (scale * (2.0 * bias - mean) + beta).reshape(1, -1, 1, 1)
        y = s + offset
    else:
        y = (scale.reshape(1, -1, 1, 1) * (s - mean.reshape(1, -1, 1, 1))
             + beta.reshape(1, -1, 1, 1))
    return jnp.maximum(y, 0.0)


if __name__ == "__main__":
    key = jax.random.PRNGKey(0)
    k1, k2, k3, k4, k5, k6, k7 = jax.random.split(key, 7)

    # Small shapes consistent with the module: in_channels=4 with alpha_in=0.5 means
    # X_h has 2 channels at 16x16 and X_l has 2 channels at 8x8; out_channels=8.
    N = 2
    in_channels, out_channels = 4, 8
    H, W = 16, 16
    KH, KW = 3, 3
    cin_h = in_channels // 2
    cin_l = in_channels - cin_h

    x_h = jax.random.normal(k1, (N, cin_h, H, W), dtype=jnp.float32)
    x_l = jax.random.normal(k2, (N, cin_l, H // 2, W // 2), dtype=jnp.float32)
    weights = jax.random.normal(k3, (out_channels, in_channels, KH, KW),
                                dtype=jnp.float32) * 0.1
    bias = jnp.zeros((out_channels,), dtype=jnp.float32)  # bias=False in the module

    # BatchNorm2d parameters (inference / running-stats form).
    gamma = 0.5 + 0.5 * jax.random.uniform(k4, (out_channels,), dtype=jnp.float32)
    beta = 0.1 * jax.random.normal(k5, (out_channels,), dtype=jnp.float32)
    running_mean = 0.1 * jax.random.normal(k6, (out_channels,), dtype=jnp.float32)
    running_var = 0.8 + 0.4 * jax.random.uniform(k7, (out_channels,),
                                                 dtype=jnp.float32)

    fwd = jax.jit(functools.partial(last_octave_cbr, alpha_in=0.5, alpha_out=0.0,
                                    stride=1, padding=1))
    out = fwd(x_h, x_l, weights, bias, gamma, beta, running_mean, running_var)
    out = jax.block_until_ready(out)
    assert out.shape == (N, out_channels, H, W)

    # Tight check against an XLA reference that uses the same numerics as the kernel
    # (BN scale folded into the f32 weights before the bf16 cast, f32 accumulation).
    ref_matched = _reference(x_h, x_l, weights, bias, gamma, beta, running_mean,
                             running_var, compute_dtype=jnp.bfloat16,
                             fold_scale_into_weights=True)
    assert jnp.allclose(out, ref_matched, atol=1e-3, rtol=1e-3), (
        float(jnp.max(jnp.abs(out - ref_matched))))

    # Loose check against the full-f32 module semantics (bf16 matmul precision).
    ref_f32 = _reference(x_h, x_l, weights, bias, gamma, beta, running_mean,
                         running_var, compute_dtype=jnp.float32)
    assert jnp.allclose(out, ref_f32, atol=1e-1, rtol=1e-1), (
        float(jnp.max(jnp.abs(out - ref_f32))))

    print("KERNEL_OK")
</pallas_src>

<mosaic_0001>
module attributes {stable_mosaic.version = 11 : i64} {
  func.func @_last_octave_cbr_kernel(%arg0: i32, %arg1: memref<36x256xbf16, #tpu.memory_space<vmem>>, %arg2: memref<8x36xbf16, #tpu.memory_space<vmem>>, %arg3: memref<8x1xf32, #tpu.memory_space<vmem>>, %arg4: memref<8x256xf32, #tpu.memory_space<vmem>>) attributes {dimension_semantics = [#tpu.dimension_semantics<parallel>], iteration_bounds = array<i64: 2>, scalar_prefetch = 0 : i64, scratch_operands = 0 : i64, tpu.core_type = #tpu.core_type<tc>, window_params = [{transform_indices = @transform_0, window_bounds = array<i64: 36, 256>}, {pipeline_mode = #tpu.pipeline_mode<synchronous>, transform_indices = @transform_1, window_bounds = array<i64: 8, 36>}, {pipeline_mode = #tpu.pipeline_mode<synchronous>, transform_indices = @transform_2, window_bounds = array<i64: 8, 1>}, {transform_indices = @transform_3, window_bounds = array<i64: 8, 256>}]} {
    %c0 = arith.constant 0 : index
    %c0_0 = arith.constant 0 : index
    %0 = vector.load %arg2[%c0, %c0_0] : memref<8x36xbf16, #tpu.memory_space<vmem>>, vector<8x36xbf16>
    %c0_1 = arith.constant 0 : index
    %c0_2 = arith.constant 0 : index
    %1 = vector.load %arg1[%c0_1, %c0_2] : memref<36x256xbf16, #tpu.memory_space<vmem>>, vector<36x256xbf16>
    %cst = arith.constant dense<0.000000e+00> : vector<8x256xf32>
    %2 = tpu.matmul %0, %1, %cst {dimension_numbers = #tpu.dot_dimension_numbers<[1], [0], [0], [1], [0, 0, 1, 1], [], []>} : vector<8x36xbf16>, vector<36x256xbf16>, vector<8x256xf32> -> vector<8x256xf32>
    %c0_3 = arith.constant 0 : index
    %c0_4 = arith.constant 0 : index
    %3 = vector.load %arg3[%c0_3, %c0_4] : memref<8x1xf32, #tpu.memory_space<vmem>>, vector<8x1xf32>
    %4 = vector.broadcast %3 : vector<8x1xf32> to vector<8x256xf32>
    %5 = arith.addf %2, %4 : vector<8x256xf32>
    %cst_5 = arith.constant 0.000000e+00 : f32
    %6 = vector.broadcast %cst_5 : f32 to vector<8x256xf32>
    %7 = arith.maximumf %5, %6 : vector<8x256xf32>
    %c0_6 = arith.constant 0 : index
    %c0_7 = arith.constant 0 : index
    %8 = vector.load %arg4[%c0_6, %c0_7] : memref<8x256xf32, #tpu.memory_space<vmem>>, vector<8x256xf32>
    tpu.vector_store %arg4[%c0_6, %c0_7], %7 {strides = array<i32>} : memref<8x256xf32, #tpu.memory_space<vmem>>, vector<8x256xf32>,
    return
  }
  func.func @transform_0(%arg0: i32) -> (i32, i32) {
    %c0_i32 = arith.constant 0 : i32
    %c0_i32_0 = arith.constant 0 : i32
    return %c0_i32, %arg0 : i32, i32
  }
  func.func @transform_1(%arg0: i32) -> (i32, i32) {
    %c0_i32 = arith.constant 0 : i32
    %c0_i32_0 = arith.constant 0 : i32
    %c0_i32_1 = arith.constant 0 : i32
    return %c0_i32, %c0_i32_0 : i32, i32
  }
  func.func @transform_2(%arg0: i32) -> (i32, i32) {
    %c0_i32 = arith.constant 0 : i32
    %c0_i32_0 = arith.constant 0 : i32
    %c0_i32_1 = arith.constant 0 : i32
    return %c0_i32, %c0_i32_0 : i32, i32
  }
  func.func @transform_3(%arg0: i32) -> (i32, i32) {
    %c0_i32 = arith.constant 0 : i32
    %c0_i32_0 = arith.constant 0 : i32
    return %c0_i32, %arg0 : i32, i32
  }
}

</mosaic_0001>

<bundles_post_ra>
// kernel: last_octave_cbr.1
= control target key start
LH: loop header
LB: loop body
LE: loop exit
PB: predicated region body
PF: predicated region fallthrough
CT: control target
= control target key end

     0   :  { %s481_s12 = smov 0   ;;  %s483_s13 = smov 0   ;;  %s539_s0 = inlined_call_operand.vmem [shape: bf16[36,512], index: 0, kind: input, shape index: {}]   ;;  %s540_s1 = inlined_call_operand.vmem [shape: bf16[8,36], index: 1, kind: input, shape index: {}]   ;;  %s541_s2 = inlined_call_operand.vmem [shape: f32[8,1], index: 2, kind: input, shape index: {}]   ;;  %s542_s3 = inlined_call_operand.vmem [shape: f32[8,512], index: 3, kind: output, shape index: {}]  }
   0x1   :  { %s485_s14 = smov 0  }
   0x2 LB: > { %s380_s15 = sadd.s32 4294967295, %s458_s14   ;;  %s498_s16 = sadd.s32 1, %s458_s14   ;;  %s458_s14 = sphi %s485_s14, %s545_s14   ;;  %s454_s13 = sphi %s483_s13, %s544_s13   ;;  %s450_s12 = sphi %s481_s12, %s543_s12  }
   0x3   : > { %s17_s17 = ssub.s32 %s458_s14, %s498_s16  ;;  %s20_s18 = sadd.s32 1, %s454_s13 }
   0x4   : > { %p18_p0 = scmp.eq.s32.totalorder %s17_s17, 0  ;;  %p27_p1 = scmp.ne.s32.totalorder %s454_s13, %s450_s12 }
   0x5   : > { %p28_p2 = scmp.eq.s32.totalorder %s458_s14, 0  ;;  %p383_p4 = scmp.ge.s32.totalorder %s458_s14, 2 }
   0x6   : > { %s507_s19 = scalar_select %p18_p0, %s454_s13, %s20_s18  }
   0x7   : > { %p29_p3 = por %p28_p2, %p27_p1  ;;  %127 = sbr.rel (%p383_p4) target bundleno = 21 (0x15), region = 24 }
   0xe   : > { %130 = sbr.rel (!%p29_p3) target bundleno = 21 (0x15), region = 28  ;;  %s132_s20 = sand.u32 (%p29_p3), 1, %s454_s13  }
   0xf   : > { %s399_s21 = sshll.u32 (%p29_p3), %s458_s14, 3  ;;  %s400_s22 = smul.u32 (%p29_p3), 40, %s132_s20 }
  0x10   : > { %s137_s25 = scalar_lea.vmem (%p29_p3), %s539_s0, %s399_s21 }
  0x11   : > { %v173_v0 = vld [vmem:[%s137_s25] sm:$0xff] (%p29_p3)  ;;  %v175_v1 = vld [vmem:[%s137_s25 + $0x10] sm:$0xff] (%p29_p3)  ;;  %s134_s26 = scalar_lea.vmem (%p29_p3), [#allocation2], %s400_s22 }
  0x12   : > { %v177_v2 = vld [vmem:[%s137_s25 + $0x20] sm:$0xff] (%p29_p3)  ;;  %v179_v3 = vld [vmem:[%s137_s25 + $0x30] sm:$0xff] (%p29_p3)  ;;  %174 = vst [vmem:[%s134_s26] sm:$0xff] (%p29_p3), %v173_v0  ;;  %176 = vst [vmem:[%s134_s26 + $0x8] sm:$0xff] (%p29_p3), %v175_v1 }
  0x13   : > { %v181_v4 = vld [vmem:[%s137_s25 + $0x40] sm:$0xff] (%p29_p3)  ;;  %178 = vst [vmem:[%s134_s26 + $0x10] sm:$0xff] (%p29_p3), %v177_v2  ;;  %180 = vst [vmem:[%s134_s26 + $0x18] sm:$0xff] (%p29_p3), %v179_v3 }
  0x14   : > { %182 = vst [vmem:[%s134_s26 + $0x20] sm:$0xff] (%p29_p3), %v181_v4 }
  0x15 PF: > { %p386_p5 = scmp.ge.s32.totalorder %s458_s14, 1  ;;  %p187_p6 = scmp.lt.s32.totalorder %s458_s14, 3 }
  0x17   : > { %p188_p7 = pnand %p386_p5, %p187_p6 }
  0x18   : > { %s194_s27 = sand.u32 (!%p188_p7), 1, %s450_s12   ;;  %v460_v5 = vmov (!%p188_p7), 0   ;;  %v231_v6 = vld [vmem:[%s541_s2] sm:$0xff] (!%p188_p7)  ;;  %vm266_vm0 = vcmask (!%p188_p7), 1041408   ;;  %vm262_vm1 = vcmask (!%p188_p7), 293888   ;;  %s387_s7 = sshll.u32 (!%p188_p7), %s380_s15, 1 }
  0x19   : > { %191 = sbr.rel (%p188_p7) target bundleno = 260 (0x104), region = 66  ;;  %305 = vmatprep.mubr.bf16.mxu0 (!%p188_p7), %v460_v5  ;;  %427 = vset.pattern.permute.xlu0 (!%p188_p7), %v460_v5  ;;  %v225_v15 = vld [vmem:[%s540_s1] sm:$0xf] (!%p188_p7)  ;;  %p219_p8 = scmp.lt.s32.totalorder (!%p188_p7), %s387_s7, 3 }
  0x1a   : > { %s401_s28 = smul.u32 (!%p188_p7), 40, %s194_s27  ;;  %234 = vperm.xlu0 (!%p188_p7), %427, %v231_v6  }
  0x1c   : > { %s196_s4 = scalar_lea.vmem (!%p188_p7), [#allocation2], %s401_s28 }
  0x1d   : > { %v428_v7 = vld [vmem:[%s196_s4 + $0x4] ss:$8 sps:$4 sm:$0xff] (!%p188_p7)   ;;  %v430_v8 = vld [vmem:[%s196_s4] ss:$8 sps:$4 sm:$0xff] (!%p188_p7)   ;;  %v431_v9 = vld [vmem:[%s196_s4 + $0x14] ss:$8 sps:$4 sm:$0xff] (!%p188_p7)  }
  0x1e   : > { %273 = vmatprep.subr.bf16.mxu0 (!%p188_p7), %v428_v7  ;;  %v230_v10 = vld [vmem:[%s196_s4 + $0x20] sm:$0x33] (!%p188_p7)  ;;  %v433_v11 = vld [vmem:[%s196_s4 + $0x10] ss:$8 sps:$4 sm:$0xff] (!%p188_p7)  }
  0x1f   : > { %274 = vmatpush1.bf16.msra.mxu0 (!%p188_p7), %v430_v8  ;;  %v394_v12 = vcombine.high (!%p188_p7), %v230_v10, %v230_v10  ;;  %v393_v13 = vcombine.low (!%p188_p7), %v230_v10, %v230_v10 }
  0x20   : > { %275 = vmatprep.subr.bf16.mxu0 %v431_v9  ;;  %s547_s7 = smov (!%p219_p8, %s387_s7), 3 }
  0x21   : > { %v268_v14 = vsel %vm266_vm0, %v393_v13, 0  ;;  %s388_s8 = sshll.u32 %s547_s7, 3 }
  0x22   : > { %s222_s11 = scalar_lea.vmem %s542_s3, %s388_s8 }
  0x23   : > { %276 = vmatpush1.bf16.msra.mxu0 %v433_v11 }
  0x24   : > { %395 = vmatprep.subr.msk.bf16.mxu0 %vm266_vm0, %v394_v12 }
  0x27   : > { %278 = vmatpush1.bf16.msra.mxu0 %v268_v14 }
  0x2a   : > { %396 = vmatmul.mubr.msk.bf16.vlgmr.msra.gmra.mrb[0].mxu0 %vm262_vm1, %v225_v15 }
  0x99   : > { %v235_v16 = vpop.permute.xlu0 %234 }
  0xfd   : > { %v307_v17 = vpop.f32.mrb[0].mxu0 }
  0xfe   : > { %v308_v18 = vadd.f32 %v307_v17, %v235_v16  ;;  %v309_v19 = vpop.f32.mrb[1].mxu0 }
  0xff   : > { %v310_v20 = vadd.f32 %v309_v19, %v235_v16  ;;  %v311_v21 = vpop.f32.mrb[2].mxu0 }
 0x100   : > { %v314_v22 = vmax.f32 %v308_v18, 0.0  ;;  %v312_v23 = vpop.f32.mrb[3].mxu0 }
 0x101   : > { %v315_v24 = vmax.f32 %v310_v20, 0.0 }
 0x102   : > { %316 = vst [vmem:[%s222_s11] sm:$0xff] %v314_v22 }
 0x103   : > { %317 = vst [vmem:[%s222_s11 + $0x8] sm:$0xff] %v315_v24 }
 0x104 PF: > { %p10_p9 = scmp.ge.s32.totalorder %s498_s16, 4   ;;  %s543_s12 = smov %s454_s13 }
 0x105   : > { %s544_s13 = smov %s507_s19  ;;  %s545_s14 = smov %s498_s16 }
 0x106   :  { %12 = sbr.rel (!%p10_p9) target bundleno = 2 (0x2), region = 105 }

</bundles_post_ra>
